<compile_context>
chip_gen: v7x
topology: tpu7x:2x2x1
jax: 0.10.0
libtpu: 0.0.40
codegen_flags: <defaults>
</compile_context>

<pallas_src>
import functools

import jax
import jax.numpy as jnp
from jax.experimental import pallas as pl
from jax.experimental.pallas import tpu as pltpu

LANE = 128  # TPU lane width: channel axes are padded to a multiple of this.


def _round_up(x, m):
    return (x + m - 1) // m * m


def _largest_divisor_leq(n, cap):
    for d in range(min(n, cap), 0, -1):
        if n % d == 0:
            return d
    return n


def _fold_bn(gamma, beta, mean, var, eps):
    inv_std = jax.lax.rsqrt(var + eps)
    scale = gamma * inv_std
    bias = beta - mean * scale
    return scale, bias


# --------------------------------------------------------------------------
# cv1: 1x1 conv + BN + SiLU  ==  per-pixel channel matmul, tiled over rows.
# --------------------------------------------------------------------------
def _pw_conv_bn_silu_kernel(x_ref, w_ref, s_ref, b_ref, o_ref):
    # x_ref: (TM, C1p) bf16   w_ref: (C1p, Cp) bf16 (resident)
    # s_ref/b_ref: (1, Cp) f32 (folded BN)          o_ref: (TM, Cp) bf16
    acc = jnp.dot(x_ref[...], w_ref[...], preferred_element_type=jnp.float32)
    y = acc * s_ref[...] + b_ref[...]
    y = y * jax.nn.sigmoid(y)          # SiLU; sigmoid -> EUP
    o_ref[...] = y.astype(o_ref.dtype)


def _pointwise_conv_bn_silu(x2d, w_mat, scale, bias, *, tm, out_dtype):
    M, Kp = x2d.shape
    Cp = w_mat.shape[1]
    return pl.pallas_call(
        _pw_conv_bn_silu_kernel,
        out_shape=jax.ShapeDtypeStruct((M, Cp), out_dtype),
        grid_spec=pltpu.PrefetchScalarGridSpec(
            num_scalar_prefetch=0,
            grid=(M // tm,),
            in_specs=[
                pl.BlockSpec((tm, Kp), lambda i: (i, 0)),
                pl.BlockSpec((Kp, Cp), lambda i: (0, 0)),   # weight resident
                pl.BlockSpec((1, Cp), lambda i: (0, 0)),
                pl.BlockSpec((1, Cp), lambda i: (0, 0)),
            ],
            out_specs=pl.BlockSpec((tm, Cp), lambda i: (i, 0)),
        ),
        compiler_params=pltpu.CompilerParams(
            dimension_semantics=("parallel",),
            vmem_limit_bytes=32 * 1024 * 1024,
        ),
    )(x2d, w_mat, scale, bias)


# --------------------------------------------------------------------------
# cv2: 3x3 conv + BN + SiLU (+ residual), no im2col.
# Grid (N, H/TH); each step DMAs a (TH+2)-row halo'd NHWC tile into VMEM and
# accumulates 9 shifted (TH*W, Cp) x (Cp, C2p) matmuls on the MXU.
# --------------------------------------------------------------------------
def _conv3x3_bn_silu_kernel(xp_hbm, w_ref, s_ref, b_ref, *rest, th, w_out, add):
    if add:
        res_ref, o_ref, buf, sem = rest
    else:
        o_ref, buf, sem = rest

    n = pl.program_id(0)
    h = pl.program_id(1)
    row0 = pl.multiple_of(h * th, th)

    # Manual DMA of the halo'd row tile: (TH+2, W+2, Cp) from padded NHWC HBM.
    cp = pltpu.make_async_copy(xp_hbm.at[n, pl.ds(row0, th + 2)], buf, sem)
    cp.start()
    cp.wait()

    cp_in = buf.shape[-1]
    c2p = o_ref.shape[-1]

    acc = jnp.zeros((th * w_out, c2p), jnp.float32)
    for i in range(3):                 # statically unrolled 3x3 taps
        for j in range(3):
            tap = buf[i:i + th, j:j + w_out, :]          # (TH, W, Cp) bf16
            tap = tap.reshape(th * w_out, cp_in)
            acc = acc + jnp.dot(tap, w_ref[i * 3 + j],
                                preferred_element_type=jnp.float32)

    y = acc * s_ref[...] + b_ref[...]                    # folded BatchNorm
    y = y * jax.nn.sigmoid(y)                            # SiLU
    if add:
        y = y + res_ref[0].reshape(th * w_out, c2p).astype(jnp.float32)
    o_ref[0] = y.reshape(th, w_out, c2p).astype(o_ref.dtype)


def _conv3x3_bn_silu(y_nhwc, w_mat9, scale, bias, residual, *, th, add,
                     out_dtype):
    N, H, W, Cp = y_nhwc.shape
    C2p = w_mat9.shape[-1]
    yp = jnp.pad(y_nhwc, ((0, 0), (1, 1), (1, 1), (0, 0)))   # spatial pad=1

    kern = functools.partial(_conv3x3_bn_silu_kernel, th=th, w_out=W, add=add)

    in_specs = [
        pl.BlockSpec(memory_space=pl.ANY),                    # padded act (manual DMA)
        pl.BlockSpec((9, Cp, C2p), lambda n, h: (0, 0, 0)),   # weights resident
        pl.BlockSpec((1, C2p), lambda n, h: (0, 0)),
        pl.BlockSpec((1, C2p), lambda n, h: (0, 0)),
    ]
    args = [yp, w_mat9, scale, bias]
    if add:
        in_specs.append(pl.BlockSpec((1, th, W, C2p), lambda n, h: (n, h, 0, 0)))
        args.append(residual)

    return pl.pallas_call(
        kern,
        out_shape=jax.ShapeDtypeStruct((N, H, W, C2p), out_dtype),
        grid_spec=pltpu.PrefetchScalarGridSpec(
            num_scalar_prefetch=0,
            grid=(N, H // th),
            in_specs=in_specs,
            out_specs=pl.BlockSpec((1, th, W, C2p), lambda n, h: (n, h, 0, 0)),
            scratch_shapes=[
                pltpu.VMEM((th + 2, W + 2, Cp), y_nhwc.dtype),
                pltpu.SemaphoreType.DMA(()),
            ],
        ),
        compiler_params=pltpu.CompilerParams(
            dimension_semantics=("parallel", "parallel"),
            vmem_limit_bytes=32 * 1024 * 1024,
        ),
    )(*args)


# --------------------------------------------------------------------------
# Bottleneck forward (eval mode, BN folded).
# --------------------------------------------------------------------------
def bottleneck_forward(x_nchw, p, *, shortcut=True, groups=1, eps=1e-5,
                       tm=256, th_rows=8):
    if groups != 1:
        raise NotImplementedError("groups > 1 not supported")  # TODO(synk)

    N, C1, H, W = x_nchw.shape
    C_ = p["w1"].shape[0]
    C2 = p["w2"].shape[0]
    add = bool(shortcut) and (C1 == C2)

    C1p = _round_up(C1, LANE)
    Cmp = _round_up(C_, LANE)
    C2p = _round_up(C2, LANE)

    # NCHW -> NHWC once at the module boundary; channels padded to lane width.
    x_nhwc = jnp.transpose(x_nchw, (0, 2, 3, 1))
    x_pad = jnp.pad(x_nhwc, ((0, 0), (0, 0), (0, 0), (0, C1p - C1)))

    # Fold BN and prepare padded bf16 weights (tiny, done once in XLA).
    s1, b1 = _fold_bn(p["g1"], p["b1"], p["m1"], p["v1"], eps)
    s2, b2 = _fold_bn(p["g2"], p["b2"], p["m2"], p["v2"], eps)

    w1_mat = jnp.transpose(p["w1"][:, :, 0, 0], (1, 0))            # (C1, C_)
    w1_mat = jnp.pad(w1_mat, ((0, C1p - C1), (0, Cmp - C_))).astype(jnp.bfloat16)
    s1p = jnp.pad(s1, (0, Cmp - C_)).reshape(1, Cmp).astype(jnp.float32)
    b1p = jnp.pad(b1, (0, Cmp - C_)).reshape(1, Cmp).astype(jnp.float32)

    w2_mat = jnp.transpose(p["w2"], (2, 3, 1, 0)).reshape(9, C_, C2)
    w2_mat = jnp.pad(w2_mat, ((0, 0), (0, Cmp - C_), (0, C2p - C2))).astype(jnp.bfloat16)
    s2p = jnp.pad(s2, (0, C2p - C2)).reshape(1, C2p).astype(jnp.float32)
    b2p = jnp.pad(b2, (0, C2p - C2)).reshape(1, C2p).astype(jnp.float32)

    # ---- cv1: 1x1 conv as a row-tiled matmul, bf16 MXU, bf16 intermediate ----
    M = N * H * W
    tm_eff = min(tm, M)
    Mp = _round_up(M, tm_eff)
    x2d = x_pad.reshape(M, C1p).astype(jnp.bfloat16)
    x2d = jnp.pad(x2d, ((0, Mp - M), (0, 0)))
    y1 = _pointwise_conv_bn_silu(x2d, w1_mat, s1p, b1p, tm=tm_eff,
                                 out_dtype=jnp.bfloat16)
    y1 = y1[:M].reshape(N, H, W, Cmp)

    # ---- cv2: 3x3 conv (9 shifted matmuls) + BN + SiLU + fused residual ----
    th = _largest_divisor_leq(H, th_rows)
    residual = x_pad if add else None          # residual added in f32 epilogue
    out = _conv3x3_bn_silu(y1, w2_mat, s2p, b2p, residual, th=th, add=add,
                           out_dtype=x_nchw.dtype)

    out = out[..., :C2]                        # drop lane padding
    return jnp.transpose(out, (0, 3, 1, 2))    # back to NCHW at the boundary


# --------------------------------------------------------------------------
# Pure-JAX reference (f32) for correctness checking.
# --------------------------------------------------------------------------
def _reference(x, p, *, shortcut=True, eps=1e-5):
    def conv_bn_silu(x, w, g, b, m, v, pad):
        y = jax.lax.conv_general_dilated(
            x, w, window_strides=(1, 1), padding=((pad, pad), (pad, pad)),
            dimension_numbers=("NCHW", "OIHW", "NCHW"))
        scale = (g / jnp.sqrt(v + eps))[None, :, None, None]
        bias = (b - m * g / jnp.sqrt(v + eps))[None, :, None, None]
        y = y * scale + bias
        return y * jax.nn.sigmoid(y)

    y = conv_bn_silu(x, p["w1"], p["g1"], p["b1"], p["m1"], p["v1"], 0)
    y = conv_bn_silu(y, p["w2"], p["g2"], p["b2"], p["m2"], p["v2"], 1)
    add = shortcut and x.shape[1] == p["w2"].shape[0]
    return x + y if add else y


if __name__ == "__main__":
    # Bottleneck(c1=8, c2=8, shortcut=True, e=0.5) -> c_ = 4
    N, C1, C2, H, W = 2, 8, 8, 16, 16
    C_ = int(C2 * 0.5)

    key = jax.random.PRNGKey(0)
    ks = jax.random.split(key, 11)
    x = jax.random.normal(ks[0], (N, C1, H, W), dtype=jnp.float32)
    p = dict(
        w1=0.1 * jax.random.normal(ks[1], (C_, C1, 1, 1), jnp.float32),
        g1=1.0 + 0.1 * jax.random.normal(ks[2], (C_,), jnp.float32),
        b1=0.1 * jax.random.normal(ks[3], (C_,), jnp.float32),
        m1=0.1 * jax.random.normal(ks[4], (C_,), jnp.float32),
        v1=jnp.abs(1.0 + 0.1 * jax.random.normal(ks[5], (C_,), jnp.float32)),
        w2=0.1 * jax.random.normal(ks[6], (C2, C_, 3, 3), jnp.float32),
        g2=1.0 + 0.1 * jax.random.normal(ks[7], (C2,), jnp.float32),
        b2=0.1 * jax.random.normal(ks[8], (C2,), jnp.float32),
        m2=0.1 * jax.random.normal(ks[9], (C2,), jnp.float32),
        v2=jnp.abs(1.0 + 0.1 * jax.random.normal(ks[10], (C2,), jnp.float32)),
    )

    out = bottleneck_forward(x, p, shortcut=True)
    out = jax.block_until_ready(out)

    ref = _reference(x, p, shortcut=True)
    assert out.shape == (N, C2, H, W)
    max_err = jnp.max(jnp.abs(out - ref))
    # bf16 MXU inputs + bf16 intermediate -> tolerance accordingly.
    assert jnp.allclose(out, ref, atol=2e-2, rtol=2e-2), f"mismatch, max err {max_err}"
    print("KERNEL_OK")
</pallas_src>

<mosaic_0001>
module attributes {stable_mosaic.version = 11 : i64} {
  func.func @_pw_conv_bn_silu_kernel(%arg0: i32, %arg1: memref<256x128xbf16, #tpu.memory_space<vmem>>, %arg2: memref<128x128xbf16, #tpu.memory_space<vmem>>, %arg3: memref<1x128xf32, #tpu.memory_space<vmem>>, %arg4: memref<1x128xf32, #tpu.memory_space<vmem>>, %arg5: memref<256x128xbf16, #tpu.memory_space<vmem>>) attributes {dimension_semantics = [#tpu.dimension_semantics<parallel>], iteration_bounds = array<i64: 2>, scalar_prefetch = 0 : i64, scratch_operands = 0 : i64, tpu.core_type = #tpu.core_type<tc>, window_params = [{transform_indices = @transform_0, window_bounds = array<i64: 256, 128>}, {pipeline_mode = #tpu.pipeline_mode<synchronous>, transform_indices = @transform_1, window_bounds = array<i64: 128, 128>}, {pipeline_mode = #tpu.pipeline_mode<synchronous>, transform_indices = @transform_2, window_bounds = array<i64: 1, 128>}, {pipeline_mode = #tpu.pipeline_mode<synchronous>, transform_indices = @transform_3, window_bounds = array<i64: 1, 128>}, {transform_indices = @transform_4, window_bounds = array<i64: 256, 128>}]} {
    %c0 = arith.constant 0 : index
    %c0_0 = arith.constant 0 : index
    %0 = vector.load %arg1[%c0, %c0_0] : memref<256x128xbf16, #tpu.memory_space<vmem>>, vector<256x128xbf16>
    %c0_1 = arith.constant 0 : index
    %c0_2 = arith.constant 0 : index
    %1 = vector.load %arg2[%c0_1, %c0_2] : memref<128x128xbf16, #tpu.memory_space<vmem>>, vector<128x128xbf16>
    %cst = arith.constant dense<0.000000e+00> : vector<256x128xf32>
    %2 = tpu.matmul %0, %1, %cst {dimension_numbers = #tpu.dot_dimension_numbers<[1], [0], [0], [1], [0, 0, 1, 1], [], []>} : vector<256x128xbf16>, vector<128x128xbf16>, vector<256x128xf32> -> vector<256x128xf32>
    %c0_3 = arith.constant 0 : index
    %c0_4 = arith.constant 0 : index
    %3 = vector.load %arg3[%c0_3, %c0_4] : memref<1x128xf32, #tpu.memory_space<vmem>>, vector<1x128xf32>
    %4 = vector.broadcast %3 : vector<1x128xf32> to vector<256x128xf32>
    %5 = arith.mulf %2, %4 : vector<256x128xf32>
    %c0_5 = arith.constant 0 : index
    %c0_6 = arith.constant 0 : index
    %6 = vector.load %arg4[%c0_5, %c0_6] : memref<1x128xf32, #tpu.memory_space<vmem>>, vector<1x128xf32>
    %7 = vector.broadcast %6 : vector<1x128xf32> to vector<256x128xf32>
    %8 = arith.addf %5, %7 : vector<256x128xf32>
    %9 = arith.negf %8 : vector<256x128xf32>
    %10 = math.exp %9 : vector<256x128xf32>
    %cst_7 = arith.constant 1.000000e+00 : f32
    %11 = vector.broadcast %cst_7 : f32 to vector<256x128xf32>
    %12 = arith.addf %11, %10 : vector<256x128xf32>
    %13 = arith.divf %11, %12 : vector<256x128xf32>
    %14 = arith.mulf %8, %13 : vector<256x128xf32>
    %15 = arith.truncf %14 : vector<256x128xf32> to vector<256x128xbf16>
    %c0_8 = arith.constant 0 : index
    %c0_9 = arith.constant 0 : index
    %16 = vector.load %arg5[%c0_8, %c0_9] : memref<256x128xbf16, #tpu.memory_space<vmem>>, vector<256x128xbf16>
    tpu.vector_store %arg5[%c0_8, %c0_9], %15 {strides = array<i32>} : memref<256x128xbf16, #tpu.memory_space<vmem>>, vector<256x128xbf16>,
    return
  }
  func.func @transform_0(%arg0: i32) -> (i32, i32) {
    %c0_i32 = arith.constant 0 : i32
    %c0_i32_0 = arith.constant 0 : i32
    return %arg0, %c0_i32 : i32, i32
  }
  func.func @transform_1(%arg0: i32) -> (i32, i32) {
    %c0_i32 = arith.constant 0 : i32
    %c0_i32_0 = arith.constant 0 : i32
    %c0_i32_1 = arith.constant 0 : i32
    return %c0_i32, %c0_i32_0 : i32, i32
  }
  func.func @transform_2(%arg0: i32) -> (i32, i32) {
    %c0_i32 = arith.constant 0 : i32
    %c0_i32_0 = arith.constant 0 : i32
    %c0_i32_1 = arith.constant 0 : i32
    return %c0_i32, %c0_i32_0 : i32, i32
  }
  func.func @transform_3(%arg0: i32) -> (i32, i32) {
    %c0_i32 = arith.constant 0 : i32
    %c0_i32_0 = arith.constant 0 : i32
    %c0_i32_1 = arith.constant 0 : i32
    return %c0_i32, %c0_i32_0 : i32, i32
  }
  func.func @transform_4(%arg0: i32) -> (i32, i32) {
    %c0_i32 = arith.constant 0 : i32
    %c0_i32_0 = arith.constant 0 : i32
    return %arg0, %c0_i32 : i32, i32
  }
}

</mosaic_0001>

<bundles_post_ra>
// kernel: tpu_custom_call.1
= control target key start
LH: loop header
LB: loop body
LE: loop exit
PB: predicated region body
PF: predicated region fallthrough
CT: control target
= control target key end

     0   :  { %9 = vsyncpa [#allocation3], 0  ;;  %s2324_s0 = inlined_call_operand.hbm [shape: bf16[512,128], index: 0, kind: input, shape index: {}]   ;;  %s2325_s1 = inlined_call_operand.hbm [shape: bf16[128,128], index: 1, kind: input, shape index: {}]   ;;  %s2326_s2 = inlined_call_operand.vmem [shape: f32[1,128], index: 2, kind: input, shape index: {}]   ;;  %s2327_s3 = inlined_call_operand.vmem [shape: f32[1,128], index: 3, kind: input, shape index: {}]   ;;  %s2328_s4 = inlined_call_operand.hbm [shape: bf16[512,128], index: 4, kind: output, shape index: {}]  }
   0x1   :  { %11 = vsyncpa [#allocation3 + $0x1], 0 }
   0x2   :  { %12 = vsyncpa [#allocation6], 0 }
   0x3   :  { %13 = vsyncpa [#allocation4], 0 }
   0x4   :  { %15 = vsyncpa [#allocation4 + $0x1], 0  ;;  %s1844_s15 = smov 0   ;;  %s1846_s16 = smov 0  }
   0x5   :  { %s1848_s17 = smov 0   ;;  %s1850_s18 = smov 0  }
   0x6 LB: > { %s1865_s19 = sadd.s32 4294967295, %s1810_s18   ;;  %s1146_s20 = sadd.s32 4294967294, %s1810_s18   ;;  %s1810_s18 = sphi %s1850_s18, %s2348_s18   ;;  %s1806_s17 = sphi %s1848_s17, %s2347_s17   ;;  %s1802_s16 = sphi %s1846_s16, %s2346_s16   ;;  %s1798_s15 = sphi %s1844_s15, %s2345_s15  }
   0x7   : > { %p41_p0 = scmp.ne.s32.totalorder %s1802_s16, %s1798_s15  ;;  %p2329_p1 = scmp.eq.s32.totalorder %s1865_s19, 0 }
   0x8   : > { %p134_p3 = scmp.eq.s32.totalorder %s1146_s20, 1  ;;  %p1147_p5 = scmp.ge.s32.totalorder %s1810_s18, 1 }
   0x9   : > { %p1874_p4 = por %p2329_p1, %p41_p0  ;;  %p141_p7 = scmp.lt.s32.totalorder %s1810_s18, 3 }
   0xa   : > { %p1879_p6 = por %p134_p3, %p41_p0  ;;  %s1812_s24 = smov [#allocation5]  }
   0xb   : > { %s2332_s21 = scalar_select %p1874_p4, 1, 0 }
   0xc   : > { %s2333_s22 = scalar_select %p1879_p6, 1, 0 }
   0xd   : > { %p1884_p8 = pnand %p1147_p5, %p141_p7  ;;  %s153_s25 = sshll.u32 %s1812_s24, 4  ;;  %s1888_s25 = int_to_ptr.vmem [resolvable:$true] %s153_s25 }
   0xe   : > { %s1900_s27 = sadd.s32 1, %s1810_s18   ;;  %s28_s28 = sadd.s32 1, %s1806_s17 }
   0xf   : > { %s2334_s23 = scalar_select %p1884_p8, 1, 0 }
  0x10   : > { %p1477_p9 = pneg %p1884_p8  ;;  %s25_s29 = ssub.s32 %s1810_s18, %s1900_s27 }
  0x11   : > { %s1682_s6 = scalar_lea.hbm %s2325_s1, 1024 }
  0x12   : > { %p1895_p11 = pnand %p1477_p9, %p2329_p1  ;;  %p1683_p12 = scmp.ne.s32.totalorder %s2325_s1, %s1682_s6 }
  0x13   : > { %p1689_p5 = scmp.lt.u32.totalorder %s1682_s6, %s2325_s1 }
  0x14   : > { %p1684_p13 = pneg %p1895_p11 }
  0x16   : > { %p1685_p0 = pnand %p1684_p13, %p1683_p12 }
  0x18   : > { %p1686_p3 = pneg %p1685_p0 }
  0x1a   : > { %p1691_p7 = pnand %p1689_p5, %p1686_p3 }
  0x1c   : > { %1694 = shalt.err (!%p1691_p7)
}
  0x1d   : > { %s1695_s11 = scalar_lea.vmem %s1888_s25, 1024  ;;  %p1703_p2 = scmp.lt.s32.totalorder %s1888_s25, %s1888_s25 }
  0x1e   : > { %p1696_p9 = scmp.ne.s32.totalorder %s1888_s25, %s1695_s11  ;;  %p1704_p6 = scmp.lt.s32.totalorder %s1695_s11, %s1695_s11 }
  0x20   : > { %p1698_p10 = pnand %p1696_p9, %p1684_p13  ;;  %p1705_p4 = por %p1704_p6, %p1703_p2 }
  0x22   : > { %p1699_p1 = pneg %p1698_p10 }
  0x24   : > { %p1706_p8 = pnand %p1705_p4, %p1699_p1 }
  0x26   : > { %1709 = shalt.err (!%p1706_p8)
}
  0x27   : > { %s1813_s12 = smov 64   ;;  %s1814_s13 = smov 4  }
  0x28   : > { %1480 = dma.hbm_to_vmem [thread:$0]  (!%p1895_p11), %s2325_s1, 1024, %s1888_s25, [#allocation6], %s1813_s12, %s1813_s12, %s1814_s13  }
  0x29   : > { %p26_p1 = scmp.eq.s32.totalorder %s25_s29, 0  ;;  %p35_p2 = scmp.ne.s32.totalorder %s1806_s17, %s1802_s16 }
  0x2a   : > { %p36_p4 = scmp.eq.s32.totalorder %s1810_s18, 0  ;;  %p1490_p6 = scmp.lt.s32.totalorder %s1810_s18, 2 }
  0x2b   : > { %s1934_s24 = scalar_select %p26_p1, %s1806_s17, %s28_s28  }
  0x2c   : > { %p37_p8 = por %p36_p4, %p35_p2  ;;  %p2336_p10 = scmp.eq.s32.totalorder %s1865_s19, 1 }
  0x2d   : > { %s173_s26 = sand.u32 1, %s1806_s17   ;;  %s1252_s5 = sshll.u32 %s1810_s18, 11 }
  0x2e   : > { %p1938_p12 = por %p2336_p10, %p35_p2  ;;  %s1150_s6 = sshll.u32 %s173_s26, 7 }
  0x2f   : > { %s1947_s9 = scalar_lea.hbm %s2324_s0, %s1252_s5  ;;  %s177_s25 = scalar_lea.vmem [#allocation2], %s1150_s6 }
  0x30   : > { %s184_s28 = sshll.u32 %s177_s25, 4  ;;  %p1949_p11 = pnand %p1490_p6, %p37_p8  ;;  %s1953_s28 = int_to_ptr.vmem [resolvable:$true] %s184_s28 }
  0x31   : > { %s1955_s10 = scalar_lea.sflag [#allocation3], %s173_s26  ;;  %s1710_s11 = scalar_lea.hbm %s1947_s9, 2048 }
  0x32   : > { %p1711_p13 = scmp.ne.s32.totalorder %s1947_s9, %s1710_s11  ;;  %p1712_p0 = pneg %p1949_p11 }
  0x33   : > { %s1715_s5 = scalar_lea.hbm %s2324_s0, 4096  ;;  %p1716_p7 = scmp.lt.u32.totalorder %s1947_s9, %s2324_s0 }
  0x34   : > { %p1713_p3 = pnand %p1712_p0, %p1711_p13  ;;  %p1717_p9 = scmp.lt.u32.totalorder %s1715_s5, %s1710_s11 }
  0x35   : > { %p1719_p2 = scmp.lt.u32.totalorder %s1710_s11, %s1947_s9 }
  0x36   : > { %p1714_p5 = pneg %p1713_p3  ;;  %p1718_p1 = por %p1717_p9, %p1716_p7 }
  0x38   : > { %p1720_p4 = por %p1719_p2, %p1718_p1 }
  0x3a   : > { %p1721_p6 = pnand %p1720_p4, %p1714_p5 }
  0x3c   : > { %1724 = shalt.err (!%p1721_p6)
}
  0x3d   : > { %s1725_s26 = scalar_lea.vmem %s1953_s28, 2048  ;;  %s1815_s8 = smov [#allocation2]  }
  0x3e   : > { %p1726_p8 = scmp.ne.s32.totalorder %s1953_s28, %s1725_s26  ;;  %s1730_s25 = sshll.u32 %s1815_s8, 4  ;;  %s1731_s25 = int_to_ptr.vmem [resolvable:$false] %s1730_s25 }
  0x3f   : > { %s1732_s14 = scalar_lea.vmem %s1731_s25, 4096  ;;  %p1733_p3 = scmp.lt.s32.totalorder %s1953_s28, %s1731_s25 }
  0x40   : > { %p1728_p10 = pnand %p1726_p8, %p1712_p0  ;;  %p1734_p7 = scmp.lt.s32.totalorder %s1732_s14, %s1725_s26 }
  0x42   : > { %p1729_p13 = pneg %p1728_p10  ;;  %p1735_p9 = por %p1734_p7, %p1733_p3 }
  0x44   : > { %p1736_p1 = pnand %p1735_p9, %p1729_p13 }
  0x46   : > { %1739 = shalt.err (!%p1736_p1)
}
  0x47   : > { %1484 = dma.hbm_to_vmem [thread:$0]  (!%p1949_p11), %s1947_s9, 2048, %s1953_s28, %s1955_s10, %s1813_s12, %s1813_s12, %s1814_s13  }
  0x48   : > { %p2339_p0 = scmp.ne.s32.totalorder %s2334_s23, 0 }
  0x49   : > { %s1989_s11 = sand.u32 (!%p2339_p0), 1, %s1802_s16   ;;  %p2340_p5 = scmp.ne.s32.totalorder (!%p2339_p0), %s2332_s21, 0 }
  0x4a   : > { %196 = sbr.rel (%p2339_p0) target bundleno = 436 (0x1b4), region = 36  ;;  %s1154_s20 = sshll.u32 (!%p2339_p0), %s1989_s11, 7 }
  0x4b   : > { %s199_s5 = scalar_lea.sflag (!%p2339_p0), [#allocation3], %s1989_s11  ;;  %s1995_s29 = scalar_lea.vmem (!%p2339_p0), [#allocation2], %s1154_s20 }
  0x51   : > { %1785 = dma.done.wait (%p2340_p5), %s199_s5, 2048  }
  0x52   : > { %1787 = vsyncadd (%p2340_p5), %s199_s5, 4294965248  ;;  %p2341_p11 = scmp.eq.s32.totalorder %s1865_s19, 0 }
  0x54   : > { %1789 = dma.done.wait (%p2341_p11), [#allocation6], 1024   ;;  %p2342_p2 = pmov %p2341_p11 }
  0x55   : > { %v1530_v0 = vld [vmem:[#allocation5] sm:$0xff]   ;;  %v1531_v1 = vld [vmem:[#allocation5 + $0x8] sm:$0xff]   ;;  %v1532_v2 = vld [vmem:[#allocation5 + $0x10] sm:$0xff]   ;;  %s2185_s9 = scalar_lea.vmem [#allocation7], %s1154_s20  ;;  %s1285_s28 = sshll.u32 %s1865_s19, 11 }
  0x56   : > { %1791 = vsyncadd (%p2342_p2), [#allocation6], 4294966272  ;;  %1405 = vmatprep.subr.bf16.mxu0 %v1530_v0  ;;  %1453 = vmatprep.subr.bf16.mxu1 %v1530_v0  ;;  %v1533_v3 = vld [vmem:[#allocation5 + $0x18] sm:$0xff]   ;;  %v1538_v4 = vld [vmem:[%s1995_s29] sm:$0xff]   ;;  %s1063_s10 = sshll.u32 %s2185_s9, 4  ;;  %s2275_s19 = scalar_lea.hbm %s2328_s4, %s1285_s28  ;;  %s2277_s10 = int_to_ptr.vmem [resolvable:$true] %s1063_s10 }
  0x57   : > { %1406 = vmatpush3.bf16.msra.mxu0 %v1530_v0  ;;  %1461 = vmatpush3.bf16.msra.mxu1 %v1530_v0  ;;  %v1539_v5 = vld [vmem:[%s1995_s29 + $0x40] sm:$0xff]   ;;  %v1535_v7 = vld [vmem:[#allocation5 + $0x28] sm:$0xff]   ;;  %v1536_v8 = vld [vmem:[#allocation5 + $0x30] sm:$0xff]   ;;  %s1050_s26 = scalar_lea.sflag [#allocation4], %s1989_s11  ;;  %s1740_s8 = scalar_lea.vmem %s2277_s10, 2048 }
  0x58   : > { %1407 = vmatprep.subr.bf16.mxu0 %v1531_v1  ;;  %1454 = vmatprep.subr.bf16.mxu1 %v1531_v1  ;;  %v1534_v6 = vld [vmem:[#allocation5 + $0x20] sm:$0xff]   ;;  %v1537_v9 = vld [vmem:[#allocation5 + $0x38] sm:$0xff]   ;;  %v1540_v10 = vld [vmem:[%s1995_s29 + $0x8] sm:$0xff]   ;;  %p1741_p4 = scmp.ne.s32.totalorder %s2277_s10, %s1740_s8  ;;  %s1816_s25 = smov [#allocation7]  }
  0x59   : > { %1421 = vmatprep.mubr.bf16.mxu0 %v1538_v4  ;;  %1437 = vmatprep.mubr.bf16.mxu1 %v1539_v5  ;;  %v1541_v11 = vld [vmem:[%s1995_s29 + $0x48] sm:$0xff]   ;;  %v1542_v12 = vld [vmem:[%s1995_s29 + $0x10] sm:$0xff]   ;;  %v1544_v14 = vld [vmem:[%s1995_s29 + $0x18] sm:$0xff]   ;;  %s1744_s14 = sshll.u32 %s1816_s25, 4  ;;  %s1745_s14 = int_to_ptr.vmem [resolvable:$false] %s1744_s14 }
  0x5a   : > { %v1543_v13 = vld [vmem:[%s1995_s29 + $0x50] sm:$0xff]   ;;  %v1545_v15 = vld [vmem:[%s1995_s29 + $0x58] sm:$0xff]   ;;  %v1546_v16 = vld [vmem:[%s1995_s29 + $0x20] sm:$0xff]   ;;  %p1742_p6 = pnand %p1741_p4, %p1938_p12  ;;  %s1746_s20 = scalar_lea.vmem %s1745_s14, 4096 }
  0x5b   : > { %1408 = vmatpush3.bf16.msra.mxu0 %v1531_v1  ;;  %1462 = vmatpush3.bf16.msra.mxu1 %v1531_v1  ;;  %v1547_v17 = vld [vmem:[%s1995_s29 + $0x60] sm:$0xff]   ;;  %v1548_v18 = vld [vmem:[%s1995_s29 + $0x28] sm:$0xff]   ;;  %v1550_v20 = vld [vmem:[%s1995_s29 + $0x30] sm:$0xff]   ;;  %p1747_p10 = scmp.lt.s32.totalorder %s2277_s10, %s1745_s14  ;;  %p1748_p13 = scmp.lt.s32.totalorder %s1746_s20, %s1740_s8 }
  0x5c   : > { %1409 = vmatprep.subr.bf16.mxu0 %v1532_v2  ;;  %1455 = vmatprep.subr.bf16.mxu1 %v1532_v2  ;;  %v1549_v19 = vld [vmem:[%s1995_s29 + $0x68] sm:$0xff]   ;;  %v1551_v21 = vld [vmem:[%s1995_s29 + $0x70] sm:$0xff]   ;;  %v1552_v22 = vld [vmem:[%s1995_s29 + $0x38] sm:$0xff]   ;;  %p1743_p8 = pneg %p1742_p6 }
  0x5d   : > { %v1553_v23 = vld [vmem:[%s1995_s29 + $0x78] sm:$0xff]   ;;  %v2024_v24 = vld [vmem:[%s2326_s2] ss:$0 sm:$0xff]  ;;  %p1749_p3 = por %p1748_p13, %p1747_p10 }
  0x5e   : > { %v2029_v26 = vld [vmem:[%s2327_s3] ss:$0 sm:$0xff] }
  0x5f   : > { %1410 = vmatpush3.bf16.msra.mxu0 %v1532_v2  ;;  %1463 = vmatpush3.bf16.msra.mxu1 %v1532_v2  ;;  %p1750_p7 = pnand %p1749_p3, %p1743_p8 }
  0x60   : > { %1411 = vmatprep.subr.bf16.mxu0 %v1533_v3  ;;  %1456 = vmatprep.subr.bf16.mxu1 %v1533_v3 }
  0x63   : > { %1412 = vmatpush3.bf16.msra.mxu0 %v1533_v3  ;;  %1464 = vmatpush3.bf16.msra.mxu1 %v1533_v3 }
  0x64   : > { %1413 = vmatprep.subr.bf16.mxu0 %v1534_v6  ;;  %1457 = vmatprep.subr.bf16.mxu1 %v1534_v6 }
  0x67   : > { %1414 = vmatpush3.bf16.msra.mxu0 %v1534_v6  ;;  %1465 = vmatpush3.bf16.msra.mxu1 %v1534_v6 }
  0x68   : > { %1415 = vmatprep.subr.bf16.mxu0 %v1535_v7  ;;  %1458 = vmatprep.subr.bf16.mxu1 %v1535_v7 }
  0x6b   : > { %1416 = vmatpush3.bf16.msra.mxu0 %v1535_v7  ;;  %1466 = vmatpush3.bf16.msra.mxu1 %v1535_v7 }
  0x6c   : > { %1417 = vmatprep.subr.bf16.mxu0 %v1536_v8  ;;  %1459 = vmatprep.subr.bf16.mxu1 %v1536_v8 }
  0x6f   : > { %1418 = vmatpush3.bf16.msra.mxu0 %v1536_v8  ;;  %1467 = vmatpush3.bf16.msra.mxu1 %v1536_v8 }
  0x70   : > { %1419 = vmatprep.subr.bf16.mxu0 %v1537_v9  ;;  %1460 = vmatprep.subr.bf16.mxu1 %v1537_v9 }
  0x73   : > { %1420 = vmatpush3.bf16.msra.mxu0 %v1537_v9  ;;  %1468 = vmatpush3.bf16.msra.mxu1 %v1537_v9 }
  0x76   : > { %1422 = vmatmul.mubr.bf16.vlgmr.msra.gmra.mrb[0].mxu0 %v1540_v10  ;;  %1438 = vmatmul.mubr.bf16.vlgmr.msra.gmra.mrb[0].mxu1 %v1541_v11 }
  0x77   : > { %1425 = vmatprep.mubr.bf16.mxu0 %v1542_v12  ;;  %1441 = vmatprep.mubr.bf16.mxu1 %v1543_v13 }
  0x7e   : > { %1426 = vmatmul.mubr.bf16.gmra.mrb[4].mxu0 %v1544_v14  ;;  %1442 = vmatmul.mubr.bf16.gmra.mrb[4].mxu1 %v1545_v15 }
  0x7f   : > { %1429 = vmatprep.mubr.bf16.mxu0 %v1546_v16  ;;  %1445 = vmatprep.mubr.bf16.mxu1 %v1547_v17 }
  0x86   : > { %1430 = vmatmul.mubr.bf16.gmra.mrb[8].mxu0 %v1548_v18  ;;  %1446 = vmatmul.mubr.bf16.gmra.mrb[8].mxu1 %v1549_v19 }
  0x87   : > { %1433 = vmatprep.mubr.bf16.mxu0 %v1550_v20  ;;  %1449 = vmatprep.mubr.bf16.mxu1 %v1551_v21 }
  0x8e   : > { %1434 = vmatmul.mubr.bf16.gmra.mrb[12].mxu0 %v1552_v22  ;;  %1450 = vmatmul.mubr.bf16.gmra.mrb[12].mxu1 %v1553_v23 }
 0x149   : > { %v1423_v25 = vpop.f32.mrb[0].mxu0  ;;  %v1439_v27 = vpop.f32.mrb[0].mxu1 }
 0x14a   : > { %v596_v28 = vmul.f32 %v1423_v25, %v2024_v24  ;;  %v612_v29 = vmul.f32 %v1439_v27, %v2024_v24  ;;  %v460_v30 = vpop.f32.mrb[1].mxu0  ;;  %v524_v31 = vpop.f32.mrb[1].mxu1 }
 0x14b   : > { %v594_v32 = vmul.f32 %v2024_v24, %v460_v30  ;;  %v610_v33 = vmul.f32 %v2024_v24, %v524_v31  ;;  %v1424_v34 = vpop.f32.mrb[2].mxu0  ;;  %v1440_v35 = vpop.f32.mrb[2].mxu1 }
 0x14c   : > { %v2036_v36 = vadd.f32 %v2029_v26, %v596_v28  ;;  %v2039_v37 = vadd.f32 %v2029_v26, %v612_v29  ;;  %v597_v38 = vmul.f32 %v1424_v34, %v2024_v24  ;;  %v613_v39 = vmul.f32 %v1440_v35, %v2024_v24  ;;  %v463_v40 = vpop.f32.mrb[3].mxu0  ;;  %v527_v41 = vpop.f32.mrb[3].mxu1 }
 0x14d   : > { %v2044_v42 = vadd.f32 %v2029_v26, %v594_v32  ;;  %v2047_v43 = vadd.f32 %v2029_v26, %v610_v33  ;;  %v595_v44 = vmul.f32 %v2024_v24, %v463_v40  ;;  %v611_v45 = vmul.f32 %v2024_v24, %v527_v41 }
 0x14e   : > { %v1185_v46 = vmul.f32 -1.442695, %v2036_v36  ;;  %v1201_v47 = vmul.f32 -1.442695, %v2039_v37  ;;  %v2054_v48 = vadd.f32 %v2029_v26, %v597_v38  ;;  %v2057_v49 = vadd.f32 %v2029_v26, %v613_v39 }
 0x14f   : > { %v1183_v50 = vmul.f32 -1.442695, %v2044_v42  ;;  %v1199_v51 = vmul.f32 -1.442695, %v2047_v43  ;;  %v2062_v52 = vadd.f32 %v2029_v26, %v595_v44  ;;  %v2065_v53 = vadd.f32 %v2029_v26, %v611_v45 }
 0x150   : > { %1554 = vpow2.f32 %v1185_v46  ;;  %v1186_v54 = vmul.f32 -1.442695, %v2054_v48  ;;  %v1202_v55 = vmul.f32 -1.442695, %v2057_v49 }
 0x151   : > { %1556 = vpow2.f32 %v1201_v47  ;;  %v1427_v56 = vpop.f32.mrb[4].mxu0  ;;  %v1443_v57 = vpop.f32.mrb[4].mxu1  ;;  %v1184_v58 = vmul.f32 -1.442695, %v2062_v52  ;;  %v1200_v63 = vmul.f32 -1.442695, %v2065_v53 }
 0x152   : > { %1558 = vpow2.f32 %v1183_v50  ;;  %v600_v59 = vmul.f32 %v1427_v56, %v2024_v24  ;;  %v616_v60 = vmul.f32 %v1443_v57, %v2024_v24  ;;  %v476_v61 = vpop.f32.mrb[5].mxu0  ;;  %v540_v62 = vpop.f32.mrb[5].mxu1 }
 0x153   : > { %1560 = vpow2.f32 %v1199_v51  ;;  %v598_v0 = vmul.f32 %v2024_v24, %v476_v61  ;;  %v614_v1 = vmul.f32 %v2024_v24, %v540_v62  ;;  %v1428_v2 = vpop.f32.mrb[6].mxu0  ;;  %v1444_v3 = vpop.f32.mrb[6].mxu1 }
 0x154   : > { %1562 = vpow2.f32 %v1186_v54  ;;  %v2076_v4 = vadd.f32 %v2029_v26, %v600_v59  ;;  %v2079_v5 = vadd.f32 %v2029_v26, %v616_v60  ;;  %v601_v6 = vmul.f32 %v1428_v2, %v2024_v24  ;;  %v479_v7 = vpop.f32.mrb[7].mxu0  ;;  %v543_v8 = vpop.f32.mrb[7].mxu1 }
 0x155   : > { %1564 = vpow2.f32 %v1202_v55  ;;  %v2083_v9 = vadd.f32 %v2029_v26, %v598_v0  ;;  %v2086_v10 = vadd.f32 %v2029_v26, %v614_v1  ;;  %v617_v11 = vmul.f32 %v1444_v3, %v2024_v24 }
 0x156   : > { %1566 = vpow2.f32 %v1184_v58  ;;  %v1189_v12 = vmul.f32 -1.442695, %v2076_v4  ;;  %v1205_v13 = vmul.f32 -1.442695, %v2079_v5  ;;  %v2092_v14 = vadd.f32 %v2029_v26, %v601_v6 }
 0x157   : > { %1568 = vpow2.f32 %v1200_v63  ;;  %v1187_v15 = vmul.f32 -1.442695, %v2083_v9  ;;  %v1203_v16 = vmul.f32 -1.442695, %v2086_v10  ;;  %v2098_v21 = vadd.f32 %v2029_v26, %v617_v11 }
 0x158   : > { %1570 = vpow2.f32 %v1189_v12  ;;  %v1190_v17 = vmul.f32 -1.442695, %v2092_v14  ;;  %v599_v28 = vmul.f32 %v2024_v24, %v479_v7  ;;  %v615_v29 = vmul.f32 %v2024_v24, %v543_v8 }
 0x159   : > { %1572 = vpow2.f32 %v1205_v13  ;;  %v1431_v18 = vpop.f32.mrb[8].mxu0  ;;  %v1447_v19 = vpop.f32.mrb[8].mxu1  ;;  %v2103_v44 = vmul.f32 -1.442695, %v2098_v21 }
 0x15a   : > { %v1555_v20 = vpop.eup %1554  ;;  %1574 = vpow2.f32 %v1187_v15  ;;  %v492_v22 = vpop.f32.mrb[9].mxu0  ;;  %v2106_v47 = vadd.f32 %v2029_v26, %v599_v28  ;;  %v2109_v50 = vadd.f32 %v2029_v26, %v615_v29  ;;  %v604_v55 = vmul.f32 %v1431_v18, %v2024_v24 }
 0x15b   : > { %v556_v23 = vpop.f32.mrb[9].mxu1  ;;  %v1557_v25 = vpop.eup %1556  ;;  %v763_v27 = vadd.f32 1.0, %v1555_v20  ;;  %1576 = vpow2.f32 %v1203_v16  ;;  %v620_v56 = vmul.f32 %v1447_v19, %v2024_v24  ;;  %v602_v59 = vmul.f32 %v2024_v24, %v492_v22 }
 0x15c   : > { %v1432_v30 = vpop.f32.mrb[10].mxu0  ;;  %v1448_v31 = vpop.f32.mrb[10].mxu1  ;;  %v779_v33 = vadd.f32 1.0, %v1557_v25  ;;  %1578 = vpow2.f32 %v1190_v17  ;;  %v618_v60 = vmul.f32 %v2024_v24, %v556_v23  ;;  %v1188_v11 = vmul.f32 -1.442695, %v2106_v47 }
 0x15d   : > { %v1559_v32 = vpop.eup %1558  ;;  %v495_v34 = vpop.f32.mrb[11].mxu0  ;;  %1580 = vrcp.f32 %v763_v27  ;;  %v605_v1 = vmul.f32 %v1432_v30, %v2024_v24  ;;  %v621_v2 = vmul.f32 %v1448_v31, %v2024_v24  ;;  %v2128_v18 = vadd.f32 %v2029_v26, %v604_v55 }
 0x15e   : > { %v1561_v35 = vpop.eup %1560  ;;  %v761_v38 = vadd.f32 1.0, %v1559_v32  ;;  %v559_v39 = vpop.f32.mrb[11].mxu1  ;;  %1582 = vrcp.f32 %v779_v33  ;;  %v603_v12 = vmul.f32 %v2024_v24, %v495_v34  ;;  %v2131_v19 = vadd.f32 %v2029_v26, %v620_v56 }
 0x15f   : > { %v1563_v40 = vpop.eup %1562  ;;  %v777_v41 = vadd.f32 1.0, %v1561_v35  ;;  %v2138_v27 = vadd.f32 %v2029_v26, %v602_v59  ;;  %v2141_v28 = vadd.f32 %v2029_v26, %v618_v60  ;;  %v2144_v31 = vadd.f32 %v2029_v26, %v605_v1 }
 0x160   : > { %v1565_v45 = vpop.eup %1564  ;;  %1584 = vrcp.f32 %v761_v38  ;;  %v764_v46 = vadd.f32 1.0, %v1563_v40  ;;  %v2147_v32 = vadd.f32 %v2029_v26, %v621_v2  ;;  %v2150_v35 = vadd.f32 %v2029_v26, %v603_v12 }
 0x161   : > { %v1567_v51 = vpop.eup %1566  ;;  %1586 = vrcp.f32 %v777_v41  ;;  %v780_v54 = vadd.f32 1.0, %v1565_v45  ;;  %v1435_v61 = vpop.f32.mrb[12].mxu0  ;;  %v619_v38 = vmul.f32 %v2024_v24, %v559_v39  ;;  %v1204_v41 = vmul.f32 -1.442695, %v2109_v50 }
 0x162   : > { %v1569_v57 = vpop.eup %1568  ;;  %1588 = vrcp.f32 %v764_v46  ;;  %v762_v58 = vadd.f32 1.0, %v1567_v51  ;;  %v1451_v62 = vpop.f32.mrb[12].mxu1  ;;  %v1193_v45 = vmul.f32 -1.442695, %v2128_v18  ;;  %v1209_v51 = vmul.f32 -1.442695, %v2131_v19 }
 0x163   : > { %v1571_v63 = vpop.eup %1570  ;;  %1590 = vrcp.f32 %v780_v54  ;;  %v778_v0 = vadd.f32 1.0, %v1569_v57  ;;  %v2117_v3 = vpop.f32.mrb[13].mxu0  ;;  %v608_v54 = vmul.f32 %v1435_v61, %v2024_v24  ;;  %v624_v55 = vmul.f32 %v1451_v62, %v2024_v24 }
 0x164   : > { %v2119_v6 = vpop.f32.mrb[13].mxu1  ;;  %v1573_v7 = vpop.eup %1572  ;;  %1592 = vrcp.f32 %v762_v58  ;;  %v767_v8 = vadd.f32 1.0, %v1571_v63  ;;  %v1191_v57 = vmul.f32 -1.442695, %v2138_v27  ;;  %v1207_v39 = vmul.f32 -1.442695, %v2141_v28 }
 0x165   : > { %v2123_v13 = vpop.f32.mrb[14].mxu0  ;;  %v2125_v15 = vpop.f32.mrb[14].mxu1  ;;  %1594 = vrcp.f32 %v778_v0  ;;  %v783_v17 = vadd.f32 1.0, %v1573_v7  ;;  %v1194_v58 = vmul.f32 -1.442695, %v2144_v31  ;;  %v2165_v0 = vadd.f32 %v2029_v26, %v619_v38 }
 0x166   : > { %v1575_v16 = vpop.eup %1574  ;;  %v2133_v20 = vpop.f32.mrb[15].mxu0  ;;  %1596 = vrcp.f32 %v767_v8  ;;  %v1210_v60 = vmul.f32 -1.442695, %v2147_v32  ;;  %v1192_v63 = vmul.f32 -1.442695, %v2150_v35  ;;  %v2172_v8 = vadd.f32 %v2029_v26, %v608_v54 }
 0x167   : > { %v2135_v22 = vpop.f32.mrb[15].mxu1  ;;  %v1577_v23 = vpop.eup %1576  ;;  %v765_v25 = vadd.f32 1.0, %v1575_v16  ;;  %1598 = vrcp.f32 %v783_v17 }
 0x168   : > { %v1579_v29 = vpop.eup %1578  ;;  %v781_v30 = vadd.f32 1.0, %v1577_v23 }
 0x169   : > { %v1581_v33 = vpop.eup %1580  ;;  %1600 = vrcp.f32 %v765_v25  ;;  %v768_v34 = vadd.f32 1.0, %v1579_v29 }
 0x16a   : > { %v1583_v40 = vpop.eup %1582  ;;  %1602 = vrcp.f32 %v781_v30  ;;  %v859_v62 = vmul.f32 %v1581_v33, %v2036_v36 }
 0x16b   : > { %v1585_v46 = vpop.eup %1584  ;;  %1604 = vrcp.f32 %v768_v34 }
 0x16c   : > { %v1587_v56 = vpop.eup %1586  ;;  %1606 = vpow2.f32 %v2103_v44  ;;  %v875_v44 = vmul.f32 %v1583_v40, %v2039_v37  ;;  %v857_v16 = vmul.f32 %v1585_v46, %v2044_v42 }
 0x16d   : > { %v1589_v59 = vpop.eup %1588  ;;  %1608 = vpow2.f32 %v1188_v11  ;;  %v2175_v11 = vadd.f32 %v2029_v26, %v624_v55  ;;  %v873_v17 = vmul.f32 %v1587_v56, %v2047_v43 }
 0x16e   : > { %v1591_v61 = vpop.eup %1590  ;;  %v860_v1 = vmul.f32 %v1589_v59, %v2054_v48  ;;  %1610 = vpow2.f32 %v1204_v41 }
 0x16f   : > { %v1593_v2 = vpop.eup %1592  ;;  %v876_v7 = vmul.f32 %v1591_v61, %v2057_v49  ;;  %1612 = vpow2.f32 %v1193_v45  ;;  %v1213_v33 = vmul.f32 -1.442695, %v2175_v11 }
 0x170   : > { %v1595_v12 = vpop.eup %1594  ;;  %v1294_v36 = vpack.c.bf16 %v860_v1, %v859_v62  ;;  %v858_v37 = vmul.f32 %v1593_v2, %v2062_v52  ;;  %1614 = vpow2.f32 %v1209_v51  ;;  %v1208_v52 = vmul.f32 -1.442695, %v2165_v0 }
 0x171   : > { %v1597_v48 = vpop.eup %1596  ;;  %v1334_v23 = vpack.c.bf16 %v876_v7, %v875_v44  ;;  %v874_v49 = vmul.f32 %v1595_v12, %v2065_v53  ;;  %1616 = vpow2.f32 %v1191_v57  ;;  %v1197_v53 = vmul.f32 -1.442695, %v2172_v8 }
 0x172   : > { %v2181_v25 = vpop.eup %1598  ;;  %1366 = vst [vmem:[%s2185_s9 + $0x8] sm:$0xff] %v1294_v36   ;;  %v1289_v42 = vpack.c.bf16 %v858_v37, %v857_v16  ;;  %1618 = vpow2.f32 %v1207_v39  ;;  %v863_v40 = vmul.f32 %v1597_v48, %v2076_v4  ;;  %v606_v4 = vmul.f32 %v2024_v24, %v2117_v3 }
 0x173   : > { %v2189_v29 = vpop.eup %1600  ;;  %1374 = vst [vmem:[%s2185_s9 + $0x48] sm:$0xff] %v1334_v23   ;;  %v1329_v43 = vpack.c.bf16 %v874_v49, %v873_v17  ;;  %1620 = vpow2.f32 %v1194_v58  ;;  %v609_v62 = vmul.f32 %v2123_v13, %v2024_v24  ;;  %v625_v2 = vmul.f32 %v2125_v15, %v2024_v24 }
 0x174   : > { %v2193_v30 = vpop.eup %1602  ;;  %1290 = vst [vmem:[%s2185_s9] sm:$0xff] %v1289_v42   ;;  %1622 = vpow2.f32 %v1210_v60  ;;  %v622_v60 = vmul.f32 %v2024_v24, %v2119_v6  ;;  %v2210_v12 = vadd.f32 %v2029_v26, %v606_v4  ;;  %v607_v6 = vmul.f32 %v2024_v24, %v2133_v20 }
 0x175   : > { %v1605_v34 = vpop.eup %1604  ;;  %1373 = vst [vmem:[%s2185_s9 + $0x40] sm:$0xff] %v1329_v43   ;;  %1624 = vpow2.f32 %v1192_v63  ;;  %v623_v37 = vmul.f32 %v2024_v24, %v2135_v22  ;;  %v2220_v17 = vadd.f32 %v2029_v26, %v609_v62  ;;  %v2223_v20 = vadd.f32 %v2029_v26, %v625_v2 }
 0x176   : > { %v1607_v38 = vpop.eup %1606  ;;  %v864_v41 = vmul.f32 %v1605_v34, %v2092_v14  ;;  %1626 = vpow2.f32 %v1208_v52  ;;  %v2215_v13 = vadd.f32 %v2029_v26, %v622_v60  ;;  %v1195_v52 = vmul.f32 -1.442695, %v2210_v12 }
 0x177   : > { %v1609_v45 = vpop.eup %1608  ;;  %v784_v46 = vadd.f32 1.0, %v1607_v38  ;;  %1628 = vpow2.f32 %v1197_v53  ;;  %v2227_v43 = vadd.f32 %v2029_v26, %v607_v6  ;;  %v2231_v53 = vadd.f32 %v2029_v26, %v623_v37 }
 0x178   : > { %v1611_v51 = vpop.eup %1610  ;;  %v1304_v54 = vpack.c.bf16 %v864_v41, %v863_v40  ;;  %v766_v55 = vadd.f32 1.0, %v1609_v45  ;;  %1630 = vpow2.f32 %v1213_v33  ;;  %v1211_v22 = vmul.f32 -1.442695, %v2215_v13 }
 0x179   : > { %v1613_v56 = vpop.eup %1612  ;;  %1632 = vrcp.f32 %v784_v46  ;;  %v782_v57 = vadd.f32 1.0, %v1611_v51  ;;  %v879_v34 = vmul.f32 %v2181_v25, %v2079_v5  ;;  %v1198_v40 = vmul.f32 -1.442695, %v2220_v17 }
 0x17a   : > { %v1615_v39 = vpop.eup %1614  ;;  %1368 = vst [vmem:[%s2185_s9 + $0x18] sm:$0xff] %v1304_v54   ;;  %1634 = vrcp.f32 %v766_v55  ;;  %v771_v58 = vadd.f32 1.0, %v1613_v56  ;;  %v861_v45 = vmul.f32 %v2189_v29, %v2083_v9  ;;  %v877_v46 = vmul.f32 %v2193_v30, %v2086_v10 }
 0x17b   : > { %v1617_v59 = vpop.eup %1616  ;;  %1636 = vrcp.f32 %v782_v57  ;;  %v787_v14 = vadd.f32 1.0, %v1615_v39  ;;  %v1214_v26 = vmul.f32 -1.442695, %v2223_v20  ;;  %v1212_v9 = vmul.f32 -1.442695, %v2231_v53 }
 0x17c   : > { %v1619_v63 = vpop.eup %1618  ;;  %1638 = vrcp.f32 %v771_v58  ;;  %v769_v61 = vadd.f32 1.0, %v1617_v59 }
 0x17d   : > { %v1621_v44 = vpop.eup %1620  ;;  %1640 = vrcp.f32 %v787_v14  ;;  %v785_v1 = vadd.f32 1.0, %v1619_v63 }
 0x17e   : > { %v1623_v7 = vpop.eup %1622  ;;  %1642 = vrcp.f32 %v769_v61  ;;  %v772_v3 = vadd.f32 1.0, %v1621_v44 }
 0x17f   : > { %v1625_v16 = vpop.eup %1624  ;;  %1644 = vrcp.f32 %v785_v1  ;;  %v788_v36 = vadd.f32 1.0, %v1623_v7 }
 0x180   : > { %v1627_v48 = vpop.eup %1626  ;;  %1646 = vrcp.f32 %v772_v3  ;;  %v770_v15 = vadd.f32 1.0, %v1625_v16 }
 0x181   : > { %v1629_v23 = vpop.eup %1628  ;;  %1648 = vrcp.f32 %v788_v36  ;;  %v786_v49 = vadd.f32 1.0, %v1627_v48 }
 0x182   : > { %v1631_v42 = vpop.eup %1630  ;;  %1650 = vrcp.f32 %v770_v15  ;;  %v775_v62 = vadd.f32 1.0, %v1629_v23 }
 0x183   : > { %v1633_v24 = vpop.eup %1632  ;;  %1652 = vrcp.f32 %v786_v49  ;;  %v791_v1 = vadd.f32 1.0, %v1631_v42 }
 0x184   : > { %v1635_v33 = vpop.eup %1634  ;;  %v880_v38 = vmul.f32 %v1633_v24, %v2098_v21  ;;  %1654 = vpow2.f32 %v1195_v52  ;;  %v1196_v21 = vmul.f32 -1.442695, %v2227_v43 }
 0x185   : > { %v1637_v41 = vpop.eup %1636  ;;  %v862_v51 = vmul.f32 %v1635_v33, %v2106_v47  ;;  %1656 = vpow2.f32 %v1211_v22 }
 0x186   : > { %v1639_v54 = vpop.eup %1638  ;;  %v1344_v55 = vpack.c.bf16 %v880_v38, %v879_v34  ;;  %v878_v5 = vmul.f32 %v1637_v41, %v2109_v50  ;;  %1658 = vpow2.f32 %v1198_v40 }
 0x187   : > { %v1641_v25 = vpop.eup %1640  ;;  %v1299_v56 = vpack.c.bf16 %v862_v51, %v861_v45  ;;  %1660 = vpow2.f32 %v1214_v26  ;;  %v867_v50 = vmul.f32 %v1639_v54, %v2128_v18 }
 0x188   : > { %v1643_v29 = vpop.eup %1642  ;;  %1376 = vst [vmem:[%s2185_s9 + $0x58] sm:$0xff] %v1344_v55   ;;  %v1339_v10 = vpack.c.bf16 %v878_v5, %v877_v46  ;;  %1662 = vpow2.f32 %v1196_v21  ;;  %v883_v4 = vmul.f32 %v1641_v25, %v2131_v19 }
 0x189   : > { %v1645_v47 = vpop.eup %1644  ;;  %1367 = vst [vmem:[%s2185_s9 + $0x10] sm:$0xff] %v1299_v56   ;;  %1664 = vpow2.f32 %v1212_v9  ;;  %v865_v60 = vmul.f32 %v1643_v29, %v2138_v27 }
 0x18a   : > { %v1647_v30 = vpop.eup %1646  ;;  %1375 = vst [vmem:[%s2185_s9 + $0x50] sm:$0xff] %v1339_v10   ;;  %v881_v18 = vmul.f32 %v1645_v47, %v2141_v28  ;;  %1666 = vrcp.f32 %v775_v62 }
 0x18b   : > { %v1649_v57 = vpop.eup %1648  ;;  %v868_v39 = vmul.f32 %v1647_v30, %v2144_v31  ;;  %1668 = vrcp.f32 %v791_v1 }
 0x18c   : > { %v1651_v58 = vpop.eup %1650  ;;  %v884_v59 = vmul.f32 %v1649_v57, %v2147_v32 }
 0x18d   : > { %v1653_v14 = vpop.eup %1652  ;;  %v1314_v63 = vpack.c.bf16 %v868_v39, %v867_v50  ;;  %v866_v61 = vmul.f32 %v1651_v58, %v2150_v35 }
 0x18e   : > { %v1354_v44 = vpack.c.bf16 %v884_v59, %v883_v4  ;;  %v882_v31 = vmul.f32 %v1653_v14, %v2165_v0  ;;  %v1655_v19 = vpop.eup %1654 }
 0x18f   : > { %1370 = vst [vmem:[%s2185_s9 + $0x28] sm:$0xff] %v1314_v63   ;;  %v1309_v2 = vpack.c.bf16 %v866_v61, %v865_v60  ;;  %v1657_v7 = vpop.eup %1656  ;;  %v773_v27 = vadd.f32 1.0, %v1655_v19 }
 0x190   : > { %1378 = vst [vmem:[%s2185_s9 + $0x68] sm:$0xff] %v1354_v44   ;;  %v1349_v32 = vpack.c.bf16 %v882_v31, %v881_v18  ;;  %v1659_v3 = vpop.eup %1658  ;;  %v789_v35 = vadd.f32 1.0, %v1657_v7 }
 0x191   : > { %1369 = vst [vmem:[%s2185_s9 + $0x20] sm:$0xff] %v1309_v2   ;;  %v1661_v6 = vpop.eup %1660  ;;  %1670 = vrcp.f32 %v773_v27  ;;  %v776_v28 = vadd.f32 1.0, %v1659_v3 }
 0x192   : > { %1377 = vst [vmem:[%s2185_s9 + $0x60] sm:$0xff] %v1349_v32   ;;  %v1663_v16 = vpop.eup %1662  ;;  %1672 = vrcp.f32 %v789_v35  ;;  %v792_v0 = vadd.f32 1.0, %v1661_v6 }
 0x193   : > { %v1665_v36 = vpop.eup %1664  ;;  %1674 = vrcp.f32 %v776_v28  ;;  %v774_v37 = vadd.f32 1.0, %v1663_v16 }
 0x194   : > { %1676 = vrcp.f32 %v792_v0  ;;  %v790_v48 = vadd.f32 1.0, %v1665_v36  ;;  %v1667_v15 = vpop.eup %1666 }
 0x195   : > { %1678 = vrcp.f32 %v774_v37  ;;  %v1669_v23 = vpop.eup %1668  ;;  %v871_v22 = vmul.f32 %v1667_v15, %v2172_v8 }
 0x196   : > { %1680 = vrcp.f32 %v790_v48  ;;  %v887_v38 = vmul.f32 %v1669_v23, %v2175_v11 }
 0x19b   : > { %v1671_v49 = vpop.eup %1670 }
 0x19c   : > { %v1673_v42 = vpop.eup %1672  ;;  %v869_v45 = vmul.f32 %v1671_v49, %v2210_v12 }
 0x19d   : > { %v1675_v52 = vpop.eup %1674 }
 0x19e   : > { %v1677_v24 = vpop.eup %1676  ;;  %v872_v33 = vmul.f32 %v1675_v52, %v2220_v17  ;;  %v885_v17 = vmul.f32 %v1673_v42, %v2215_v13 }
 0x19f   : > { %v1679_v34 = vpop.eup %1678  ;;  %v888_v40 = vmul.f32 %v1677_v24, %v2223_v20 }
 0x1a0   : > { %v1681_v41 = vpop.eup %1680  ;;  %v1324_v46 = vpack.c.bf16 %v872_v33, %v871_v22  ;;  %v870_v8 = vmul.f32 %v1679_v34, %v2227_v43 }
 0x1a1   : > { %v1364_v51 = vpack.c.bf16 %v888_v40, %v887_v38  ;;  %v886_v26 = vmul.f32 %v1681_v41, %v2231_v53 }
 0x1a2   : > { %1372 = vst [vmem:[%s2185_s9 + $0x38] sm:$0xff] %v1324_v46   ;;  %v1319_v11 = vpack.c.bf16 %v870_v8, %v869_v45 }
 0x1a3   : > { %1380 = vst [vmem:[%s2185_s9 + $0x78] sm:$0xff] %v1364_v51   ;;  %v1359_v12 = vpack.c.bf16 %v886_v26, %v885_v17 }
 0x1a4   : > { %1371 = vst [vmem:[%s2185_s9 + $0x30] sm:$0xff] %v1319_v11  }
 0x1a5   : > { %1379 = vst [vmem:[%s2185_s9 + $0x70] sm:$0xff] %v1359_v12  }
 0x1a6   : > { %1753 = shalt.err (!%p1750_p7)
}
 0x1a7   : > { %s1754_s5 = scalar_lea.hbm %s2275_s19, 2048  ;;  %s1758_s23 = scalar_lea.hbm %s2328_s4, 4096 }
 0x1a8   : > { %p1755_p9 = scmp.ne.s32.totalorder %s2275_s19, %s1754_s5  ;;  %p1759_p5 = scmp.lt.u32.totalorder %s2275_s19, %s2328_s4 }
 0x1a9   : > { %p1760_p11 = scmp.lt.u32.totalorder %s1758_s23, %s1754_s5  ;;  %p1762_p4 = scmp.lt.u32.totalorder %s1754_s5, %s2275_s19 }
 0x1aa   : > { %p1756_p1 = pnand %p1755_p9, %p1938_p12 }
 0x1ab   : > { %p1761_p2 = por %p1760_p11, %p1759_p5 }
 0x1ac   : > { %p1757_p0 = pneg %p1756_p1 }
 0x1ad   : > { %p1763_p6 = por %p1762_p4, %p1761_p2 }
 0x1af   : > { %p1764_p8 = pnand %p1763_p6, %p1757_p0 }
 0x1b1   : > { %1767 = shalt.err (!%p1764_p8)
}
 0x1b2   : > { %s1817_s9 = smov 64   ;;  %s1818_s28 = smov 4  }
 0x1b3   : > { %1475 = dma.vmem_to_hbm [thread:$0]  (%p1938_p12), %s2277_s10, 2048, %s2275_s19, %s1050_s26, %s1817_s9, %s1817_s9, %s1818_s28  }
 0x1b4 PF: > { %s1078_s6 = sand.u32 1, %s1798_s15   ;;  %p2343_p10 = scmp.ne.s32.totalorder %s2333_s22, 0 }
 0x1b5   : > { %p2344_p13 = scmp.ge.s32.totalorder %s1810_s18, 2  ;;  %s1079_s7 = scalar_lea.sflag [#allocation4], %s1078_s6 }
 0x1b7   : > { %p1486_p3 = pnand %p2344_p13, %p2343_p10 }
 0x1b9   : > { %1793 = dma.done.wait (!%p1486_p3), %s1079_s7, 2048  }
 0x1ba   : > { %1795 = vsyncadd (!%p1486_p3), %s1079_s7, 4294965248  ;;  %p18_p7 = scmp.ge.s32.totalorder %s1900_s27, 4   ;;  %s2345_s15 = smov %s1802_s16 }
 0x1bb   : > { %s2346_s16 = smov %s1806_s17  ;;  %s2347_s17 = smov %s1934_s24 }
 0x1bc   : > { %s2348_s18 = smov %s1900_s27  ;;  %20 = sbr.rel (!%p18_p7) target bundleno = 6 (0x6), region = 85 }
 0x1c3   :  { %1084 = vsyncpa [#allocation3], 1 }
 0x1c4   :  { %1086 = vsyncpa [#allocation3 + $0x1], 1 }
 0x1c5   :  { %1087 = vsyncpa [#allocation6], 1 }
 0x1c6   :  { %1088 = vsyncpa [#allocation4], 1 }
 0x1c7   :  { %1090 = vsyncpa [#allocation4 + $0x1], 1 }

</bundles_post_ra>
